<compile_context>
chip_gen: v6e
topology: v6e:2x2x1
jax: 0.10.0
libtpu: 0.0.40
codegen_flags: <defaults>
</compile_context>

<pallas_src>
import jax
import jax.numpy as jnp
from jax.experimental import pallas as pl
from jax.experimental.pallas import tpu as pltpu


# ----------------------------------------------------------------------------
# Generation-aware VMEM budgets.
# ----------------------------------------------------------------------------
def _tpu_vmem_capacity():
    try:
        cap = int(pltpu.get_tpu_info().vmem_capacity_bytes)
        if cap > 0:
            return cap
    except Exception:
        pass
    return 64 << 20  # conservative (v7x-sized) fallback


def _vmem_budgets():
    cap = _tpu_vmem_capacity()
    big_vmem = cap >= (100 << 20)          # v5e / v6e: 128 MiB VMEM, 1 TC
    fused_budget = (96 << 20) if big_vmem else (24 << 20)
    vmem_limit_cap = (110 << 20) if big_vmem else (48 << 20)
    likely_multicore = not big_vmem        # v7x: 64 MiB/TC, 2 TCs per chip
    return fused_budget, vmem_limit_cap, likely_multicore


# ----------------------------------------------------------------------------
# Fused single-pass kernel: one (C, L) block per batch element, x read once.
# Pool sum and rescale walk the block in lane chunks to bound vreg live ranges.
# ----------------------------------------------------------------------------
def _make_fused_kernel(C, L, chunk):
    n_full = L // chunk
    tail = L - n_full * chunk
    inv_L = 1.0 / L

    def fused_kernel(x_ref, w1_ref, b1_ref, w2_ref, b2_ref, o_ref):
        # --- squeeze: pooled mean with f32 accumulation, chunked over lanes ---
        def pool_body(i, acc):
            off = pl.multiple_of(i * chunk, chunk)
            xc = x_ref[:, pl.ds(off, chunk)]
            return acc + jnp.sum(xc, axis=-1, keepdims=True, dtype=jnp.float32)

        acc = jnp.zeros((C, 1), jnp.float32)
        if n_full > 0:
            acc = jax.lax.fori_loop(0, n_full, pool_body, acc)
        if tail > 0:
            xt = x_ref[:, pl.ds(n_full * chunk, tail)]
            acc = acc + jnp.sum(xt, axis=-1, keepdims=True, dtype=jnp.float32)
        pooled = acc * inv_L                                         # (C, 1) f32

        # --- excitation: fc1 + ReLU, fc2 + sigmoid (tiny, off the roofline) ---
        h = jnp.dot(w1_ref[...], pooled,
                    preferred_element_type=jnp.float32) + b1_ref[...]
        h = jnp.maximum(h, 0.0)
        s = jnp.dot(w2_ref[...], h,
                    preferred_element_type=jnp.float32) + b2_ref[...]
        s = jax.nn.sigmoid(s).astype(o_ref.dtype)                    # (C, 1)

        # --- rescale in native dtype, chunked, re-reading x_ref per chunk ---
        if n_full > 0:
            @pl.loop(0, n_full)
            def _(i):
                off = pl.multiple_of(i * chunk, chunk)
                o_ref[:, pl.ds(off, chunk)] = x_ref[:, pl.ds(off, chunk)] * s
        if tail > 0:
            o_ref[:, pl.ds(n_full * chunk, tail)] = (
                x_ref[:, pl.ds(n_full * chunk, tail)] * s)

    return fused_kernel


def _fused_call(x, w1, b1c, w2, b2c, *, vmem_limit):
    B, C, L = x.shape
    C_red = w1.shape[0]
    itemsize = x.dtype.itemsize
    # Lane-chunk sized so a chunk's working set stays well inside the 256 KiB
    # vreg file (~64 KiB), multiple of 128 lanes.
    chunk = max(128, (65536 // (C * max(itemsize, 4))) // 128 * 128)
    kernel = _make_fused_kernel(C, L, chunk)
    param_bytes = (w1.size + w2.size + C_red + C) * 4
    cost = pl.CostEstimate(
        flops=2 * B * C * L + 4 * B * C * C_red,
        transcendentals=B * C,
        bytes_accessed=2 * B * C * L * itemsize + param_bytes)
    return pl.pallas_call(
        kernel,
        out_shape=jax.ShapeDtypeStruct((B, C, L), x.dtype),
        grid_spec=pltpu.PrefetchScalarGridSpec(
            num_scalar_prefetch=0,
            grid=(B,),
            in_specs=[
                pl.BlockSpec((pl.Squeezed(), C, L), lambda b: (b, 0, 0)),
                pl.BlockSpec((C_red, C), lambda b: (0, 0)),
                pl.BlockSpec((C_red, 1), lambda b: (0, 0)),
                pl.BlockSpec((C, C_red), lambda b: (0, 0)),
                pl.BlockSpec((C, 1), lambda b: (0, 0)),
            ],
            out_specs=pl.BlockSpec((pl.Squeezed(), C, L), lambda b: (b, 0, 0)),
        ),
        compiler_params=pltpu.CompilerParams(
            dimension_semantics=("parallel",),
            vmem_limit_bytes=vmem_limit),
        cost_estimate=cost,
    )(x, w1, b1c, w2, b2c)


# ----------------------------------------------------------------------------
# Two-pass streaming form on the flattened (B*C, L) view.
#   Pass 1: (TR, TL) blocks -> per-row pooled mean (R, 1) f32.
#   Excite: tiny one-shot kernel on pooled (B, C) -> scale (B, C) f32.
#   Pass 2: (TR, TL) blocks, pure rescale, fully parallel grid.
# ----------------------------------------------------------------------------
def _make_pool_kernel(L, tl):
    ragged = (L % tl) != 0
    valid_tail = L % tl
    inv_L = 1.0 / L

    def pool_kernel(x_ref, p_ref, acc_ref):
        l = pl.program_id(1)
        n_l = pl.num_programs(1)

        @pl.when(l == 0)
        def _():
            acc_ref[...] = jnp.zeros_like(acc_ref)

        if not ragged:
            acc_ref[...] += jnp.sum(x_ref[...], axis=-1, keepdims=True,
                                    dtype=jnp.float32)
        else:
            # Mask only the last (partial) L tile; full tiles stay mask-free.
            @pl.when(l < n_l - 1)
            def _():
                acc_ref[...] += jnp.sum(x_ref[...], axis=-1, keepdims=True,
                                        dtype=jnp.float32)

            @pl.when(l == n_l - 1)
            def _():
                xb = x_ref[...]
                col = jax.lax.broadcasted_iota(jnp.int32, xb.shape, 1)
                xb = jnp.where(col < valid_tail, xb, jnp.zeros_like(xb))
                acc_ref[...] += jnp.sum(xb, axis=-1, keepdims=True,
                                        dtype=jnp.float32)

        @pl.when(l == n_l - 1)
        def _():
            p_ref[...] = acc_ref[...] * inv_L

    return pool_kernel


def _excite_kernel(p_ref, w1t_ref, b1_ref, w2t_ref, b2_ref, s_ref):
    h = jnp.dot(p_ref[...], w1t_ref[...],
                preferred_element_type=jnp.float32) + b1_ref[...]
    h = jnp.maximum(h, 0.0)
    s = jnp.dot(h, w2t_ref[...],
                preferred_element_type=jnp.float32) + b2_ref[...]
    s_ref[...] = jax.nn.sigmoid(s)


def _rescale_kernel(s_ref, x_ref, o_ref):
    o_ref[...] = x_ref[...] * s_ref[...].astype(x_ref.dtype)


def _two_pass_call(x, w1, b1, w2, b2, *, target_block_bytes, vmem_cap_limit):
    B, C, L = x.shape
    C_red = w1.shape[0]
    itemsize = x.dtype.itemsize

    R = B * C
    x2d = x.reshape(R, L)                      # free row-major view

    # Row tile: full rows if small, else 256 (multiple of 8).
    tr = R if R <= 256 else 256
    # Lane tile from the byte target (~1-4 MiB blocks), multiple of 128.
    tl_target = max(128, (target_block_bytes // (tr * itemsize)) // 128 * 128)
    if L <= tl_target:
        tl, nl = L, 1
    else:
        nl = pl.cdiv(L, tl_target)
        tl = ((pl.cdiv(L, nl) + 127) // 128) * 128   # balanced, lane-dense
        nl = pl.cdiv(L, tl)
    nr = pl.cdiv(R, tr)

    blk = tr * tl * itemsize
    vmem1 = int(min(vmem_cap_limit, max(16 << 20, 2 * blk + (4 << 20))))
    vmem2 = int(min(vmem_cap_limit, max(16 << 20, 4 * blk + (4 << 20))))

    # Pass 1: streaming pooled mean.
    pooled = pl.pallas_call(
        _make_pool_kernel(L, tl),
        out_shape=jax.ShapeDtypeStruct((R, 1), jnp.float32),
        grid_spec=pltpu.PrefetchScalarGridSpec(
            num_scalar_prefetch=0,
            grid=(nr, nl),                     # reduction axis (L tiles) last
            in_specs=[pl.BlockSpec((tr, tl), lambda r, l: (r, l))],
            out_specs=pl.BlockSpec((tr, 1), lambda r, l: (r, 0)),
            scratch_shapes=[pltpu.VMEM((tr, 1), jnp.float32)],
        ),
        compiler_params=pltpu.CompilerParams(
            dimension_semantics=("parallel", "arbitrary"),
            vmem_limit_bytes=vmem1),
        cost_estimate=pl.CostEstimate(
            flops=R * L, transcendentals=0,
            bytes_accessed=R * L * itemsize + R * 4),
    )(x2d)

    # Excitation on the tiny pooled tensor (one-shot kernel, whole arrays).
    scale_bc = pl.pallas_call(
        _excite_kernel,
        out_shape=jax.ShapeDtypeStruct((B, C), jnp.float32),
        cost_estimate=pl.CostEstimate(
            flops=4 * B * C * C_red, transcendentals=B * C,
            bytes_accessed=(B * C + 2 * C * C_red + C + C_red) * 4),
    )(pooled.reshape(B, C),
      jnp.transpose(w1), b1.reshape(1, C_red),
      jnp.transpose(w2), b2.reshape(1, C))
    scale = scale_bc.reshape(R, 1)

    # Pass 2: pure streaming rescale, fully parallel grid.
    out2d = pl.pallas_call(
        _rescale_kernel,
        out_shape=jax.ShapeDtypeStruct((R, L), x.dtype),
        grid_spec=pltpu.PrefetchScalarGridSpec(
            num_scalar_prefetch=0,
            grid=(nr, nl),
            in_specs=[
                pl.BlockSpec((tr, 1), lambda r, l: (r, 0)),
                pl.BlockSpec((tr, tl), lambda r, l: (r, l)),
            ],
            out_specs=pl.BlockSpec((tr, tl), lambda r, l: (r, l)),
        ),
        compiler_params=pltpu.CompilerParams(
            dimension_semantics=("parallel", "parallel"),
            vmem_limit_bytes=vmem2),
        cost_estimate=pl.CostEstimate(
            flops=R * L, transcendentals=0,
            bytes_accessed=2 * R * L * itemsize + R * 4),
    )(scale, x2d)
    return out2d.reshape(B, C, L)


# ----------------------------------------------------------------------------
# Dispatcher.
# ----------------------------------------------------------------------------
def senet_forward(x, w1, b1, w2, b2, *, force_two_pass=False,
                  target_block_bytes=2 << 20):
    B, C, L = x.shape
    C_red = w1.shape[0]
    itemsize = x.dtype.itemsize

    fused_budget, vmem_cap_limit, likely_multicore = _vmem_budgets()

    param_bytes = (w1.size + w2.size + C_red + C) * 4
    # 2 double-buffered x blocks + 2 double-buffered out blocks + 2x params.
    fused_resident = 4 * C * L * itemsize + 2 * param_bytes
    per_batch_bytes = C * L * itemsize

    use_two_pass = (
        force_two_pass
        or fused_resident > fused_budget
        # v7x only: grid=(B,) with tiny B gives each TensorCore <2 grid steps
        # (no DMA pipeline depth); the flattened two-pass grid restores it.
        # Only worth the 1.5x HBM traffic when batches are MiB-scale.
        or (likely_multicore and B < 4 and per_batch_bytes >= (2 << 20))
    )

    if not use_two_pass:
        vmem_limit = int(min(vmem_cap_limit,
                             max(32 << 20, fused_resident + (8 << 20))))
        return _fused_call(x, w1, b1.reshape(C_red, 1), w2, b2.reshape(C, 1),
                           vmem_limit=vmem_limit)

    return _two_pass_call(x, w1, b1, w2, b2,
                          target_block_bytes=target_block_bytes,
                          vmem_cap_limit=vmem_cap_limit)


def senet_reference(x, w1, b1, w2, b2):
    # Pure-JAX reference of the PyTorch SENet forward pass.
    pooled = jnp.mean(x, axis=-1, keepdims=True)                     # (B, C, 1)
    h = jnp.einsum("rc,bcl->brl", w1, pooled) + b1[None, :, None]    # (B, Cr, 1)
    h = jnp.maximum(h, 0.0)
    s = jnp.einsum("cr,brl->bcl", w2, h) + b2[None, :, None]         # (B, C, 1)
    s = jax.nn.sigmoid(s)
    return x * s


if __name__ == "__main__":
    # SENet(16) from SuperConvBlock (reduction=1).
    B, C = 2, 16
    reduction = 1
    C_red = C // reduction

    key = jax.random.PRNGKey(0)
    kx, k1, k2, k3, k4, kx2 = jax.random.split(key, 6)

    bound1 = 1.0 / jnp.sqrt(C)
    w1 = jax.random.uniform(k1, (C_red, C), jnp.float32, -bound1, bound1)
    b1 = jax.random.uniform(k2, (C_red,), jnp.float32, -bound1, bound1)
    bound2 = 1.0 / jnp.sqrt(C_red)
    w2 = jax.random.uniform(k3, (C, C_red), jnp.float32, -bound2, bound2)
    b2 = jax.random.uniform(k4, (C,), jnp.float32, -bound2, bound2)

    # --- L a multiple of 128 ---
    L = 256
    x = jax.random.normal(kx, (B, C, L), dtype=jnp.float32)
    ref = senet_reference(x, w1, b1, w2, b2)

    out_fused = jax.block_until_ready(senet_forward(x, w1, b1, w2, b2))
    assert out_fused.shape == (B, C, L)
    assert jnp.allclose(out_fused, ref, atol=1e-5, rtol=1e-5), "fused mismatch"

    out_tiled = jax.block_until_ready(
        senet_forward(x, w1, b1, w2, b2, force_two_pass=True,
                      target_block_bytes=16 * 1024))   # forces 128-lane tiles
    assert out_tiled.shape == (B, C, L)
    assert jnp.allclose(out_tiled, ref, atol=1e-5, rtol=1e-5), "two-pass mismatch"

    # --- ragged L (not a multiple of the lane tile): exercises the masked
    #     last-tile pooling and the clipped partial output blocks ---
    L2 = 300
    x2 = jax.random.normal(kx2, (B, C, L2), dtype=jnp.float32)
    ref2 = senet_reference(x2, w1, b1, w2, b2)

    out2_fused = jax.block_until_ready(senet_forward(x2, w1, b1, w2, b2))
    assert jnp.allclose(out2_fused, ref2, atol=1e-5, rtol=1e-5), \
        "fused ragged mismatch"

    out2_tiled = jax.block_until_ready(
        senet_forward(x2, w1, b1, w2, b2, force_two_pass=True,
                      target_block_bytes=16 * 1024))
    assert jnp.allclose(out2_tiled, ref2, atol=1e-5, rtol=1e-5), \
        "two-pass ragged mismatch"

    print("KERNEL_OK")
</pallas_src>

<mosaic_0001>
module attributes {stable_mosaic.version = 11 : i64} {
  func.func @fused_kernel(%arg0: i32, %arg1: memref<1x16x256xf32, #tpu.memory_space<vmem>>, %arg2: memref<16x16xf32, #tpu.memory_space<vmem>>, %arg3: memref<16x1xf32, #tpu.memory_space<vmem>>, %arg4: memref<16x16xf32, #tpu.memory_space<vmem>>, %arg5: memref<16x1xf32, #tpu.memory_space<vmem>>, %arg6: memref<1x16x256xf32, #tpu.memory_space<vmem>>) attributes {dimension_semantics = [#tpu.dimension_semantics<parallel>], iteration_bounds = array<i64: 2>, scalar_prefetch = 0 : i64, scratch_operands = 0 : i64, tpu.core_type = #tpu.core_type<tc>, window_params = [{transform_indices = @transform_0, window_bounds = array<i64: 1, 16, 256>}, {pipeline_mode = #tpu.pipeline_mode<synchronous>, transform_indices = @transform_1, window_bounds = array<i64: 16, 16>}, {pipeline_mode = #tpu.pipeline_mode<synchronous>, transform_indices = @transform_2, window_bounds = array<i64: 16, 1>}, {pipeline_mode = #tpu.pipeline_mode<synchronous>, transform_indices = @transform_3, window_bounds = array<i64: 16, 16>}, {pipeline_mode = #tpu.pipeline_mode<synchronous>, transform_indices = @transform_4, window_bounds = array<i64: 16, 1>}, {transform_indices = @transform_5, window_bounds = array<i64: 1, 16, 256>}]} {
    %cst = arith.constant 0.000000e+00 : f32
    %0 = vector.broadcast %cst : f32 to vector<16x1xf32>
    %c0 = arith.constant 0 : index
    %c0_0 = arith.constant 0 : index
    %c0_1 = arith.constant 0 : index
    %1 = vector.load %arg1[%c0, %c0_0, %c0_1] : memref<1x16x256xf32, #tpu.memory_space<vmem>>, vector<1x16x256xf32>
    %2 = vector.shape_cast %1 : vector<1x16x256xf32> to vector<16x256xf32>
    %cst_2 = arith.constant dense<0.000000e+00> : vector<16xf32>
    %3 = vector.multi_reduction <add>, %2, %cst_2 [1] : vector<16x256xf32> to vector<16xf32>
    %4 = vector.shape_cast %3 : vector<16xf32> to vector<16x1xf32>
    %5 = arith.addf %0, %4 : vector<16x1xf32>
    %cst_3 = arith.constant 3.906250e-03 : f32
    %6 = vector.broadcast %cst_3 : f32 to vector<16x1xf32>
    %7 = arith.mulf %5, %6 : vector<16x1xf32>
    %c0_4 = arith.constant 0 : index
    %c0_5 = arith.constant 0 : index
    %8 = vector.load %arg2[%c0_4, %c0_5] : memref<16x16xf32, #tpu.memory_space<vmem>>, vector<16x16xf32>
    %cst_6 = arith.constant dense<0.000000e+00> : vector<16x1xf32>
    %9 = tpu.matmul %8, %7, %cst_6 {dimension_numbers = #tpu.dot_dimension_numbers<[1], [0], [0], [1], [0, 0, 1, 1], [], []>} : vector<16x16xf32>, vector<16x1xf32>, vector<16x1xf32> -> vector<16x1xf32>
    %c0_7 = arith.constant 0 : index
    %c0_8 = arith.constant 0 : index
    %10 = vector.load %arg3[%c0_7, %c0_8] : memref<16x1xf32, #tpu.memory_space<vmem>>, vector<16x1xf32>
    %11 = arith.addf %9, %10 : vector<16x1xf32>
    %cst_9 = arith.constant 0.000000e+00 : f32
    %12 = vector.broadcast %cst_9 : f32 to vector<16x1xf32>
    %13 = arith.maximumf %11, %12 : vector<16x1xf32>
    %c0_10 = arith.constant 0 : index
    %c0_11 = arith.constant 0 : index
    %14 = vector.load %arg4[%c0_10, %c0_11] : memref<16x16xf32, #tpu.memory_space<vmem>>, vector<16x16xf32>
    %cst_12 = arith.constant dense<0.000000e+00> : vector<16x1xf32>
    %15 = tpu.matmul %14, %13, %cst_12 {dimension_numbers = #tpu.dot_dimension_numbers<[1], [0], [0], [1], [0, 0, 1, 1], [], []>} : vector<16x16xf32>, vector<16x1xf32>, vector<16x1xf32> -> vector<16x1xf32>
    %c0_13 = arith.constant 0 : index
    %c0_14 = arith.constant 0 : index
    %16 = vector.load %arg5[%c0_13, %c0_14] : memref<16x1xf32, #tpu.memory_space<vmem>>, vector<16x1xf32>
    %17 = arith.addf %15, %16 : vector<16x1xf32>
    %18 = arith.negf %17 : vector<16x1xf32>
    %19 = math.exp %18 : vector<16x1xf32>
    %cst_15 = arith.constant 1.000000e+00 : f32
    %20 = vector.broadcast %cst_15 : f32 to vector<16x1xf32>
    %21 = arith.addf %20, %19 : vector<16x1xf32>
    %22 = arith.divf %20, %21 : vector<16x1xf32>
    %c0_16 = arith.constant 0 : index
    %c0_17 = arith.constant 0 : index
    %c0_18 = arith.constant 0 : index
    %23 = vector.load %arg1[%c0_16, %c0_17, %c0_18] : memref<1x16x256xf32, #tpu.memory_space<vmem>>, vector<1x16x256xf32>
    %24 = vector.shape_cast %23 : vector<1x16x256xf32> to vector<16x256xf32>
    %25 = vector.broadcast %22 : vector<16x1xf32> to vector<16x256xf32>
    %26 = arith.mulf %24, %25 : vector<16x256xf32>
    %c0_19 = arith.constant 0 : index
    %c0_20 = arith.constant 0 : index
    %c0_21 = arith.constant 0 : index
    %27 = vector.load %arg6[%c0_19, %c0_20, %c0_21] : memref<1x16x256xf32, #tpu.memory_space<vmem>>, vector<1x16x256xf32>
    %28 = vector.shape_cast %27 : vector<1x16x256xf32> to vector<16x256xf32>
    %29 = vector.shape_cast %26 : vector<16x256xf32> to vector<1x16x256xf32>
    tpu.vector_store %arg6[%c0_19, %c0_20, %c0_21], %29 {strides = array<i32>} : memref<1x16x256xf32, #tpu.memory_space<vmem>>, vector<1x16x256xf32>,
    return
  }
  func.func @transform_0(%arg0: i32) -> (i32, i32, i32) {
    %c0_i32 = arith.constant 0 : i32
    %c0_i32_0 = arith.constant 0 : i32
    %c0_i32_1 = arith.constant 0 : i32
    return %arg0, %c0_i32, %c0_i32_0 : i32, i32, i32
  }
  func.func @transform_1(%arg0: i32) -> (i32, i32) {
    %c0_i32 = arith.constant 0 : i32
    %c0_i32_0 = arith.constant 0 : i32
    %c0_i32_1 = arith.constant 0 : i32
    return %c0_i32, %c0_i32_0 : i32, i32
  }
  func.func @transform_2(%arg0: i32) -> (i32, i32) {
    %c0_i32 = arith.constant 0 : i32
    %c0_i32_0 = arith.constant 0 : i32
    %c0_i32_1 = arith.constant 0 : i32
    return %c0_i32, %c0_i32_0 : i32, i32
  }
  func.func @transform_3(%arg0: i32) -> (i32, i32) {
    %c0_i32 = arith.constant 0 : i32
    %c0_i32_0 = arith.constant 0 : i32
    %c0_i32_1 = arith.constant 0 : i32
    return %c0_i32, %c0_i32_0 : i32, i32
  }
  func.func @transform_4(%arg0: i32) -> (i32, i32) {
    %c0_i32 = arith.constant 0 : i32
    %c0_i32_0 = arith.constant 0 : i32
    %c0_i32_1 = arith.constant 0 : i32
    return %c0_i32, %c0_i32_0 : i32, i32
  }
  func.func @transform_5(%arg0: i32) -> (i32, i32, i32) {
    %c0_i32 = arith.constant 0 : i32
    %c0_i32_0 = arith.constant 0 : i32
    %c0_i32_1 = arith.constant 0 : i32
    return %arg0, %c0_i32, %c0_i32_0 : i32, i32, i32
  }
}

</mosaic_0001>

<bundles_post_ra>
// kernel: tpu_custom_call.1
= control target key start
LH: loop header
LB: loop body
LE: loop exit
PB: predicated region body
PF: predicated region fallthrough
CT: control target
= control target key end

     0   :  { %10 = vsyncpa [#allocation3], 0  ;;  %s977_s0 = inlined_call_operand.hbm [shape: f32[2,16,256], index: 0, kind: input, shape index: {}]   ;;  %s978_s1 = inlined_call_operand.vmem [shape: f32[16,16], index: 1, kind: input, shape index: {}]   ;;  %s979_s2 = inlined_call_operand.vmem [shape: f32[16,1], index: 2, kind: input, shape index: {}]   ;;  %s980_s3 = inlined_call_operand.vmem [shape: f32[16,16], index: 3, kind: input, shape index: {}]   ;;  %s981_s4 = inlined_call_operand.vmem [shape: f32[16,1], index: 4, kind: input, shape index: {}]   ;;  %s982_s5 = inlined_call_operand.hbm [shape: f32[2,16,256], index: 5, kind: output, shape index: {}]  }
   0x1   :  { %12 = vsyncpa [#allocation3 + $0x1], 0 }
   0x2   :  { %13 = vsyncpa [#allocation4], 0 }
   0x3   :  { %15 = vsyncpa [#allocation4 + $0x1], 0  ;;  %s783_s18 = smov 0   ;;  %s785_s19 = smov 0  }
   0x4   :  { %s787_s20 = smov 0   ;;  %s789_s21 = smov 0  }
   0x5 LB: > { %s804_s22 = sadd.s32 4294967295, %s744_s21   ;;  %s547_s23 = sadd.s32 4294967294, %s744_s21   ;;  %s744_s21 = sphi %s789_s21, %s997_s21   ;;  %s740_s20 = sphi %s787_s20, %s996_s20   ;;  %s736_s19 = sphi %s785_s19, %s995_s19   ;;  %s732_s18 = sphi %s783_s18, %s994_s18  }
   0x6   : > { %s808_s24 = sadd.s32 1, %s744_s21   ;;  %s28_s25 = sadd.s32 1, %s740_s20 }
   0x7   : > { %s25_s26 = ssub.s32 %s744_s21, %s808_s24  ;;  %p35_p0 = scmp.ne.s32.totalorder %s740_s20, %s736_s19 }
   0x8   : > { %p26_p1 = scmp.eq.s32.totalorder %s25_s26, 0  ;;  %p36_p2 = scmp.eq.s32.totalorder %s744_s21, 0 }
   0x9   : > { %p41_p3 = scmp.ne.s32.totalorder %s736_s19, %s732_s18  ;;  %p42_p4 = scmp.eq.s32.totalorder %s804_s22, 0 }
   0xa   : > { %s820_s27 = scalar_select %p26_p1, %s740_s20, %s28_s25  }
   0xb   : > { %p822_p5 = por %p36_p2, %p35_p0  ;;  %p826_p6 = por %p42_p4, %p41_p3 }
   0xc   : > { %p149_p7 = scmp.eq.s32.totalorder %s804_s22, 1  ;;  %p155_p8 = scmp.eq.s32.totalorder %s547_s23, 1 }
   0xd   : > { %s986_s29 = scalar_select %p826_p6, 1, 0 }
   0xe   : > { %p603_p10 = scmp.lt.s32.totalorder %s744_s21, 2  ;;  %p833_p11 = por %p149_p7, %p35_p0 }
   0xf   : > { %p837_p12 = por %p155_p8, %p41_p3  ;;  %s187_s7 = sand.u32 1, %s740_s20  }
  0x10   : > { %s987_s30 = scalar_select %p833_p11, 1, 0 }
  0x11   : > { %s988_s6 = scalar_select %p837_p12, 1, 0 }
  0x12   : > { %s567_s8 = sshll.u32 %s744_s21, 9  ;;  %s550_s9 = sshll.u32 %s187_s7, 5 }
  0x13   : > { %s846_s12 = scalar_lea.hbm %s977_s0, %s567_s8  ;;  %s191_s13 = scalar_lea.vmem [#allocation2], %s550_s9 }
  0x14   : > { %s198_s14 = sshll.u32 %s191_s13, 4  ;;  %p850_p13 = pnand %p603_p10, %p822_p5  ;;  %s854_s14 = int_to_ptr.vmem [resolvable:$true] %s198_s14 }
  0x15   : > { %s856_s16 = scalar_lea.sflag [#allocation3], %s187_s7  ;;  %s652_s17 = scalar_lea.hbm %s846_s12, 512 }
  0x16   : > { %p653_p0 = scmp.ne.s32.totalorder %s846_s12, %s652_s17  ;;  %p654_p1 = pneg %p850_p13 }
  0x17   : > { %s657_s26 = scalar_lea.hbm %s977_s0, 1024  ;;  %p658_p4 = scmp.lt.s32.totalorder %s846_s12, %s977_s0 }
  0x18   : > { %p655_p2 = pnand %p654_p1, %p653_p0  ;;  %p659_p5 = scmp.lt.s32.totalorder %s657_s26, %s652_s17 }
  0x1a   : > { %p656_p3 = pneg %p655_p2  ;;  %p660_p7 = por %p659_p5, %p658_p4 }
  0x1c   : > { %p661_p8 = pnand %p660_p7, %p656_p3 }
  0x1e   : > { %664 = shalt.err (!%p661_p8)
}
  0x1f   : > { %s665_s7 = scalar_lea.vmem %s854_s14, 512  ;;  %s746_s9 = smov [#allocation2]  }
  0x20   : > { %p666_p10 = scmp.ne.s32.totalorder %s854_s14, %s665_s7  ;;  %s670_s10 = sshll.u32 %s746_s9, 4  ;;  %s671_s10 = int_to_ptr.vmem [resolvable:$false] %s670_s10 }
  0x21   : > { %s672_s11 = scalar_lea.vmem %s671_s10, 1024  ;;  %p673_p2 = scmp.lt.s32.totalorder %s854_s14, %s671_s10 }
  0x22   : > { %p668_p9 = pnand %p666_p10, %p654_p1  ;;  %p674_p12 = scmp.lt.s32.totalorder %s672_s11, %s665_s7 }
  0x24   : > { %p669_p0 = pneg %p668_p9  ;;  %p675_p11 = por %p674_p12, %p673_p2 }
  0x26   : > { %p676_p6 = pnand %p675_p11, %p669_p0 }
  0x28   : > { %679 = shalt.err (!%p676_p6)
}
  0x29   : > { %s747_s13 = smov 256   ;;  %s748_s17 = smov 16  }
  0x2a   : > { %598 = dma.hbm_to_vmem [thread:$0]  (!%p850_p13), %s846_s12, 512, %s854_s14, %s856_s16, %s747_s13, %s747_s13, %s748_s17  }
  0x2b   : > { %p553_p9 = scmp.ge.s32.totalorder %s744_s21, 1  ;;  %p206_p1 = scmp.lt.s32.totalorder %s744_s21, 3 }
  0x2d   : > { %p207_p3 = pnand %p553_p9, %p206_p1 }
  0x2e   : > { %s880_s23 = sand.u32 (!%p207_p3), 1, %s736_s19   ;;  %p990_p6 = scmp.ne.s32.totalorder (!%p207_p3), %s986_s29, 0 }
  0x2f   : > { %210 = sbr.rel (%p207_p3) target bundleno = 776 (0x308), region = 40  ;;  %s554_s25 = sshll.u32 (!%p207_p3), %s880_s23, 5 }
  0x30   : > { %s213_s26 = scalar_lea.sflag (!%p207_p3), [#allocation3], %s880_s23  ;;  %s216_s28 = scalar_lea.vmem (!%p207_p3), [#allocation2], %s554_s25 }
  0x34   : > { %723 = dma.done.wait (%p990_p6), %s213_s26, 512  }
  0x35   : > { %725 = vsyncadd (%p990_p6), %s213_s26, 4294966784  ;;  %v890_v0 = vld [vmem:[%s216_s28 + $0x10] sm:$0xff]  ;;  %v892_v1 = vld [vmem:[%s216_s28 + $0x18] sm:$0xff]  ;;  %vm261_vm0 = vcmask 130048   ;;  %v749_v22 = vmov 0   ;;  %s242_s29 = scalar_lea.vmem [#allocation5], %s554_s25 }
  0x36   : > { %v243_v2 = vld [vmem:[%s216_s28] sm:$0xff]  ;;  %v250_v3 = vadd.f32 %v892_v1, %v890_v0  ;;  %v244_v4 = vld [vmem:[%s216_s28 + $0x8] sm:$0xff]  ;;  %642 = vset.pattern.permute.xlu1 %v749_v22  ;;  %643 = vset.pattern.permute.xlu0 %v749_v22  ;;  %s474_s15 = sshll.u32 %s242_s29, 4  ;;  %s568_s16 = sshll.u32 %s804_s22, 9  ;;  %s927_s15 = int_to_ptr.vmem [resolvable:$true] %s474_s15 }
  0x37   : > { %v247_v5 = vadd.f32 %v244_v4, %v243_v2  ;;  %v257_v6 = vld [vmem:[%s978_s1] sm:$0xff]  ;;  %v258_v11 = vld [vmem:[%s978_s1 + $0x8] sm:$0xff]  ;;  %s932_s9 = scalar_lea.hbm %s982_s5, %s568_s16  ;;  %s461_s22 = scalar_lea.sflag [#allocation4], %s880_s23 }
  0x38   : > { %251 = vadd.xlane.f32.xlu0 %v250_v3  ;;  %581 = vmatprep.mubr.msk.f32.mxu0 %vm261_vm0, %v257_v6  ;;  %v345_v12 = vld [vmem:[%s980_s3] sm:$0xff]  ;;  %v260_v13 = vld [vmem:[%s979_s2 + $0x8] sm:$0xff]  ;;  %s680_s25 = scalar_lea.vmem %s927_s15, 512  ;;  %p991_p12 = scmp.ne.s32.totalorder %s987_s30, 0 }
  0x39   : > { %588 = vmatprep.mubr.msk.f32.mxu1 %vm261_vm0, %v345_v12  ;;  %v259_v15 = vld [vmem:[%s979_s2] sm:$0xff]  ;;  %v346_v21 = vld [vmem:[%s980_s3 + $0x8] sm:$0xff]  ;;  %p681_p11 = scmp.ne.s32.totalorder %s927_s15, %s680_s25  ;;  %s750_s10 = smov [#allocation5]  }
  0x3a   : > { %v348_v23 = vld [vmem:[%s981_s4 + $0x8] sm:$0xff]  ;;  %v347_v25 = vld [vmem:[%s981_s4] sm:$0xff]  ;;  %s684_s11 = sshll.u32 %s750_s10, 4  ;;  %s685_s11 = int_to_ptr.vmem [resolvable:$false] %s684_s11 }
  0x3b   : > { %p682_p13 = pnand %p681_p11, %p991_p12  ;;  %s686_s13 = scalar_lea.vmem %s685_s11, 1024 }
  0x3c   : > { %248 = vadd.xlane.f32.xlu0 %v247_v5  ;;  %p687_p5 = scmp.lt.s32.totalorder %s927_s15, %s685_s11  ;;  %p688_p7 = scmp.lt.s32.totalorder %s686_s13, %s680_s25 }
  0x3d   : > { %p683_p4 = pneg %p682_p13 }
  0x3e   : > { %p689_p8 = por %p688_p7, %p687_p5 }
  0x40   : > { %p690_p10 = pnand %p689_p8, %p683_p4 }
  0xc1   : > { %v252_v7 = vpop.xlane.xlu0 %251 }
  0xc2   : > { %v256_v8 = vmul.f32 0.00390625, %v252_v7 }
  0xc4   : > { %577 = vmatprep.subr.mxu0 %v256_v8 }
  0xc5   : > { %578 = vmatpush3.msra.mxu0 %v256_v8  ;;  %v249_v9 = vpop.xlane.xlu0 %248 }
  0xc6   : > { %v255_v10 = vmul.f32 0.00390625, %v249_v9 }
  0xc8   : > { %579 = vmatprep.subr.mxu0 %v255_v10 }
  0xc9   : > { %580 = vmatpush3.msra.mxu0 %v255_v10 }
  0xca   : > { %582 = vmatmul.mubr.msk.f32.vlgmr.msra.gmra.mxu0 %vm261_vm0, %v258_v11 }
 0x18a   : > { %v583_v14 = vpop.f32.mrf.mxu0 }
 0x18b   : > { %v340_v16 = vadd.f32 %v583_v14, %v260_v13 }
 0x18c   : > { %v334_v17 = vpop.f32.mrf.mxu0 }
 0x18d   : > { %v344_v18 = vmax.f32 %v340_v16, 0.0  ;;  %v335_v19 = vadd.f32 %v334_v17, %v259_v15 }
 0x18f   : > { %v343_v20 = vmax.f32 %v335_v19, 0.0  ;;  %584 = vmatprep.subr.mxu1 %v344_v18 }
 0x190   : > { %585 = vmatpush3.msra.mxu1 %v344_v18 }
 0x191   : > { %586 = vmatprep.subr.mxu1 %v343_v20 }
 0x192   : > { %587 = vmatpush3.msra.mxu1 %v343_v20 }
 0x193   : > { %589 = vmatmul.mubr.msk.f32.vlgmr.msra.gmra.mxu1 %vm261_vm0, %v346_v21 }
 0x253   : > { %v590_v24 = vpop.f32.mrf.mxu1 }
 0x254   : > { %v427_v26 = vadd.f32 %v590_v24, %v348_v23 }
 0x255   : > { %v421_v27 = vpop.f32.mrf.mxu1 }
 0x256   : > { %v561_v28 = vmul.f32 -1.442695, %v427_v26  ;;  %v422_v29 = vadd.f32 %v421_v27, %v347_v25 }
 0x258   : > { %v560_v30 = vmul.f32 -1.442695, %v422_v29  ;;  %644 = vpow2.f32 %v561_v28 }
 0x25a   : > { %646 = vpow2.f32 %v560_v30 }
 0x265   : > { %v645_v31 = vpop.eup %644 }
 0x266   : > { %v437_v34 = vadd.f32 1.0, %v645_v31 }
 0x267   : > { %v647_v32 = vpop.eup %646 }
 0x268   : > { %v436_v33 = vadd.f32 1.0, %v647_v32 }
 0x26a   : > { %648 = vrcp.f32 %v436_v33 }
 0x26b   : > { %650 = vrcp.f32 %v437_v34 }
 0x277   : > { %v649_v35 = vpop.eup %648 }
 0x278   : > { %444 = vperm.xlu1 %642, %v649_v35   ;;  %v651_v36 = vpop.eup %650 }
 0x27c   : > { %449 = vperm.xlu1 %642, %v651_v36  }
 0x2f3   : > { %v445_v37 = vpop.permute.xlu1 %444 }
 0x2f4   : > { %v452_v38 = vmul.f32 %v445_v37, %v243_v2  ;;  %v453_v39 = vmul.f32 %v445_v37, %v244_v4 }
 0x2f6   : > { %456 = vst [vmem:[%s242_s29] sm:$0xff] %v452_v38  ;;  %457 = vst [vmem:[%s242_s29 + $0x8] sm:$0xff] %v453_v39 }
 0x2f7   : > { %v450_v40 = vpop.permute.xlu1 %449 }
 0x2f8   : > { %v454_v41 = vmul.f32 %v450_v40, %v890_v0  ;;  %v455_v42 = vmul.f32 %v450_v40, %v892_v1 }
 0x2fa   : > { %458 = vst [vmem:[%s242_s29 + $0x10] sm:$0xff] %v454_v41  ;;  %459 = vst [vmem:[%s242_s29 + $0x18] sm:$0xff] %v455_v42 }
 0x2fb   : > { %693 = shalt.err (!%p690_p10)
}
 0x2fc   : > { %s694_s17 = scalar_lea.hbm %s932_s9, 512  ;;  %s698_s12 = scalar_lea.hbm %s982_s5, 1024 }
 0x2fd   : > { %p695_p0 = scmp.ne.s32.totalorder %s932_s9, %s694_s17  ;;  %p699_p1 = scmp.lt.s32.totalorder %s932_s9, %s982_s5 }
 0x2fe   : > { %p700_p3 = scmp.lt.s32.totalorder %s698_s12, %s694_s17 }
 0x2ff   : > { %p696_p2 = pnand %p695_p0, %p991_p12 }
 0x300   : > { %p701_p6 = por %p700_p3, %p699_p1 }
 0x301   : > { %p697_p9 = pneg %p696_p2 }
 0x303   : > { %p702_p11 = pnand %p701_p6, %p697_p9 }
 0x305   : > { %705 = shalt.err (!%p702_p11)
}
 0x306   : > { %s751_s16 = smov 256   ;;  %s752_s8 = smov 16  }
 0x307   : > { %593 = dma.vmem_to_hbm [thread:$0]  (%p991_p12), %s927_s15, 512, %s932_s9, %s461_s22, %s751_s16, %s751_s16, %s752_s8  }
 0x308 PF: > { %s489_s7 = sand.u32 1, %s732_s18   ;;  %p992_p13 = scmp.ne.s32.totalorder %s988_s6, 0 }
 0x309   : > { %p993_p4 = scmp.ge.s32.totalorder %s744_s21, 2  ;;  %s490_s25 = scalar_lea.sflag [#allocation4], %s489_s7 }
 0x30b   : > { %p600_p5 = pnand %p993_p4, %p992_p13 }
 0x30d   : > { %p601_p7 = pneg %p600_p5 }
 0x30f   : > { %727 = dma.done.wait (%p601_p7), %s490_s25, 512  }
 0x310   : > { %729 = vsyncadd (%p601_p7), %s490_s25, 4294966784  ;;  %p18_p8 = scmp.ge.s32.totalorder %s808_s24, 4   ;;  %s994_s18 = smov %s736_s19 }
 0x311   : > { %s995_s19 = smov %s740_s20  ;;  %s996_s20 = smov %s820_s27 }
 0x312   : > { %s997_s21 = smov %s808_s24  ;;  %20 = sbr.rel (!%p18_p8) target bundleno = 5 (0x5), region = 85 }
 0x317   :  { %495 = vsyncpa [#allocation3], 1 }
 0x318   :  { %497 = vsyncpa [#allocation3 + $0x1], 1 }
 0x319   :  { %498 = vsyncpa [#allocation4], 1 }
 0x31a   :  { %500 = vsyncpa [#allocation4 + $0x1], 1 }

</bundles_post_ra>
